<compile_context>
chip_gen: v5e
topology: v5e:2x2
jax: 0.10.0
libtpu: 0.0.40
codegen_flags: <defaults>
</compile_context>

<pallas_src>
import jax
import jax.numpy as jnp
from jax.experimental import pallas as pl
from jax.experimental.pallas import tpu as pltpu


# ----------------------------- small-N path ---------------------------------
def _linear_tanh_small_kernel(p_ref, x_ref, o_ref):
    # p_ref: (K+1, M)  rows 0..K-1 = W, row K = bias
    # x_ref: (N, K), o_ref: (N, M)
    x = x_ref[...]
    p = p_ref[...]
    N, K = x.shape
    M = p.shape[1]
    # Bias row as accumulator init (single broadcast, outside the K loop).
    y = jnp.broadcast_to(p[K:K + 1, :], (N, M))
    for k in range(K):                                  # K=3 -> unrolled VPU FMAs
        y = y + x[:, k:k + 1] * p[k:k + 1, :]
    o_ref[...] = jnp.tanh(y).astype(o_ref.dtype)        # EUP transcendental


def _linear_tanh_small(x, params, out_dtype):
    N, K = x.shape
    M = params.shape[1]
    return pl.pallas_call(
        _linear_tanh_small_kernel,
        out_shape=jax.ShapeDtypeStruct((N, M), out_dtype),
        in_specs=[
            pl.BlockSpec(memory_space=pltpu.MemorySpace.VMEM),  # fused W|b
            pl.BlockSpec(memory_space=pltpu.MemorySpace.VMEM),  # x
        ],
        out_specs=pl.BlockSpec(memory_space=pltpu.MemorySpace.VMEM),
    )(params, x)


# --------------------------- large-N lane-dense path -------------------------
def _linear_tanh_lane_dense_kernel(pt_ref, xt_ref, ot_ref):
    # pt_ref: (M, K+1) cols 0..K-1 = W^T, col K = bias
    # xt_ref: (K, TN), ot_ref: (M, TN)  -- N sits on the 128-lane axis
    K = xt_ref.shape[0]
    M, TN = ot_ref.shape
    xt = xt_ref[...]
    pt = pt_ref[...]
    y = jnp.broadcast_to(pt[:, K:K + 1], (M, TN))       # bias column as acc init
    for k in range(K):                                  # 3 outer-product FMAs on VPU
        y = y + pt[:, k:k + 1] * xt[k:k + 1, :]
    ot_ref[...] = jnp.tanh(y).astype(ot_ref.dtype)      # unmasked lane-dense vst


def _linear_tanh_lane_dense(x, params, out_dtype):
    N, K = x.shape
    M = params.shape[1]
    x_t = x.T                                            # (K, N) layout plumbing
    p_t = params.T                                       # (M, K+1)
    # Largest tile that divides N; (K,TN)+(M,TN) f32 tiles are tiny even on
    # v7x's 32 MiB scoped VMEM (double-buffered), so no vmem_limit override.
    tn = max(t for t in (2048, 1024, 512, 256, 128) if N % t == 0)
    out_t = pl.pallas_call(
        _linear_tanh_lane_dense_kernel,
        out_shape=jax.ShapeDtypeStruct((M, N), out_dtype),
        grid=(N // tn,),
        in_specs=[
            pl.BlockSpec((M, K + 1), lambda i: (0, 0)),   # params resident
            pl.BlockSpec((K, tn), lambda i: (0, i)),
        ],
        out_specs=pl.BlockSpec((M, tn), lambda i: (0, i)),
        compiler_params=pltpu.CompilerParams(
            dimension_semantics=("parallel",)),           # 2-TC shard on v7x
    )(p_t, x_t)
    return out_t.T


# --------------------------------- wrapper -----------------------------------
def linear_tanh(x, w, b, *, out_dtype=jnp.float32):
    """out = tanh(x @ w + b); w is (in_features, out_features)."""
    N, K = x.shape
    K2, M = w.shape
    assert K == K2 and b.shape == (M,)
    params = jnp.concatenate([w, b[None, :]], axis=0)     # fused (K+1, M) buffer
    if N >= 256 and N % 128 == 0:
        return _linear_tanh_lane_dense(x, params, out_dtype)
    return _linear_tanh_small(x, params, out_dtype)


def reference(x, w, b):
    return jnp.tanh(x @ w + b)


if __name__ == "__main__":
    key = jax.random.PRNGKey(0)
    kx, kw, kb, kx2 = jax.random.split(key, 4)

    K, M = 3, 12                    # nn.Linear(3, 12)
    bound = 1.0 / (K ** 0.5)        # torch default init U[-1/sqrt(K), 1/sqrt(K)]
    w = jax.random.uniform(kw, (K, M), jnp.float32, -bound, bound)
    b = jax.random.uniform(kb, (M,), jnp.float32, -bound, bound)

    # Small, module-consistent batch -> gridless path.
    x = jax.random.normal(kx, (8, K), jnp.float32)
    out = jax.block_until_ready(linear_tanh(x, w, b))
    ref = reference(x, w, b)
    assert out.shape == (8, M), out.shape
    assert jnp.allclose(out, ref, atol=1e-5, rtol=1e-5), "small-path mismatch"

    # Large batch -> lane-dense tiled path (the deployment path from the review).
    x_big = jax.random.normal(kx2, (1024, K), jnp.float32)
    out_big = jax.block_until_ready(linear_tanh(x_big, w, b))
    ref_big = reference(x_big, w, b)
    assert out_big.shape == (1024, M), out_big.shape
    assert jnp.allclose(out_big, ref_big, atol=1e-5, rtol=1e-5), "tiled-path mismatch"

    print("KERNEL_OK")
</pallas_src>

<mosaic_0001>
module attributes {stable_mosaic.version = 11 : i64} {
  func.func @_linear_tanh_small_kernel(%arg0: memref<4x12xf32, #tpu.memory_space<vmem>>, %arg1: memref<8x3xf32, #tpu.memory_space<vmem>>, %arg2: memref<8x12xf32, #tpu.memory_space<vmem>>) attributes {dimension_semantics = [], scalar_prefetch = 0 : i64, scratch_operands = 0 : i64, tpu.core_type = #tpu.core_type<tc>} {
    %c0 = arith.constant 0 : index
    %c0_0 = arith.constant 0 : index
    %0 = vector.load %arg1[%c0, %c0_0] : memref<8x3xf32, #tpu.memory_space<vmem>>, vector<8x3xf32>
    %c0_1 = arith.constant 0 : index
    %c0_2 = arith.constant 0 : index
    %1 = vector.load %arg0[%c0_1, %c0_2] : memref<4x12xf32, #tpu.memory_space<vmem>>, vector<4x12xf32>
    %2 = vector.extract_strided_slice %1 {offsets = [3, 0], sizes = [1, 12], strides = [1, 1]} : vector<4x12xf32> to vector<1x12xf32>
    %3 = vector.shape_cast %2 : vector<1x12xf32> to vector<1x12xf32>
    %4 = vector.broadcast %3 : vector<1x12xf32> to vector<8x12xf32>
    %5 = vector.extract_strided_slice %0 {offsets = [0, 0], sizes = [8, 1], strides = [1, 1]} : vector<8x3xf32> to vector<8x1xf32>
    %6 = vector.extract_strided_slice %1 {offsets = [0, 0], sizes = [1, 12], strides = [1, 1]} : vector<4x12xf32> to vector<1x12xf32>
    %7 = vector.broadcast %5 : vector<8x1xf32> to vector<8x12xf32>
    %8 = vector.broadcast %6 : vector<1x12xf32> to vector<8x12xf32>
    %9 = arith.mulf %7, %8 : vector<8x12xf32>
    %10 = arith.addf %4, %9 : vector<8x12xf32>
    %11 = vector.extract_strided_slice %0 {offsets = [0, 1], sizes = [8, 1], strides = [1, 1]} : vector<8x3xf32> to vector<8x1xf32>
    %12 = vector.extract_strided_slice %1 {offsets = [1, 0], sizes = [1, 12], strides = [1, 1]} : vector<4x12xf32> to vector<1x12xf32>
    %13 = vector.broadcast %11 : vector<8x1xf32> to vector<8x12xf32>
    %14 = vector.broadcast %12 : vector<1x12xf32> to vector<8x12xf32>
    %15 = arith.mulf %13, %14 : vector<8x12xf32>
    %16 = arith.addf %10, %15 : vector<8x12xf32>
    %17 = vector.extract_strided_slice %0 {offsets = [0, 2], sizes = [8, 1], strides = [1, 1]} : vector<8x3xf32> to vector<8x1xf32>
    %18 = vector.extract_strided_slice %1 {offsets = [2, 0], sizes = [1, 12], strides = [1, 1]} : vector<4x12xf32> to vector<1x12xf32>
    %19 = vector.broadcast %17 : vector<8x1xf32> to vector<8x12xf32>
    %20 = vector.broadcast %18 : vector<1x12xf32> to vector<8x12xf32>
    %21 = arith.mulf %19, %20 : vector<8x12xf32>
    %22 = arith.addf %16, %21 : vector<8x12xf32>
    %23 = math.tanh %22 : vector<8x12xf32>
    %c0_3 = arith.constant 0 : index
    %c0_4 = arith.constant 0 : index
    %24 = vector.load %arg2[%c0_3, %c0_4] : memref<8x12xf32, #tpu.memory_space<vmem>>, vector<8x12xf32>
    tpu.vector_store %arg2[%c0_3, %c0_4], %23 {strides = array<i32>} : memref<8x12xf32, #tpu.memory_space<vmem>>, vector<8x12xf32>,
    return
  }
}

</mosaic_0001>

<bundles_post_ra>
// kernel: tpu_custom_call.1
= control target key start
LH: loop header
LB: loop body
LE: loop exit
PB: predicated region body
PF: predicated region fallthrough
CT: control target
= control target key end

     0   :  { %v92_v1 = vmov 0   ;;  %v93_v2 = vmov 2   ;;  %s120_s0 = inlined_call_operand.vmem [shape: f32[4,12], index: 0, kind: input, shape index: {}]   ;;  %s121_s1 = inlined_call_operand.vmem [shape: f32[8,3], index: 1, kind: input, shape index: {}]   ;;  %s122_s2 = inlined_call_operand.hbm [shape: f32[8,12], index: 2, kind: output, shape index: {}]  }
   0x1   :  { %v12_v0 = vld [vmem:[%s121_s1] sm:$0xff]  ;;  %60 = vset.pattern.permute.xlu0 %v92_v1  ;;  %62 = vset.pattern.permute.xlu1 %v93_v2 }
   0x2   :  { %7 = vsyncpa [#allocation3], 0  ;;  %17 = vperm.xlu0 %60, %v12_v0   ;;  %31 = vperm.xlu1 %62, %v12_v0   ;;  %v94_v3 = vmov 1   ;;  %v13_v4 = vld [vmem:[%s120_s0] sm:$0xf]  ;;  %s95_s1 = smov [#allocation2]  }
   0x3   :  { %v20_v6 = vperm.slane %v13_v4, 0  ;;  %v14_v7 = vperm.slane %v13_v4, 3  ;;  %v27_v9 = vperm.slane %v13_v4, 1  ;;  %v34_v10 = vperm.slane %v13_v4, 2  ;;  %s45_s13 = sshll.u32 %s95_s1, 4  ;;  %s47_s0 = sshll.u32 %s122_s2, 4  ;;  %s46_s13 = int_to_ptr.vmem [resolvable:$true] %s45_s13  ;;  %s48_s0 = int_to_ptr.hbm [resolvable:$true] %s47_s0 }
   0x4   :  { %vm38_vm0 = vcmask 97280  }
   0xa   :  { %61 = vset.pattern.permute.xlu0 %v94_v3 }
   0xb   :  { %24 = vperm.xlu0 %61, %v12_v0  }
  0x13   :  { %63 = vset.pattern.permute.xlu0 %v93_v2 }
  0x74   :  { %v18_v5 = vpop.permute.xlu0 %17  ;;  %v32_v11 = vpop.permute.xlu1 %31 }
  0x75   :  { %v21_v8 = vmul.f32 %v20_v6, %v18_v5  ;;  %v35_v15 = vmul.f32 %v34_v10, %v32_v11 }
  0x77   :  { %v22_v13 = vadd.f32 %v21_v8, %v14_v7 }
  0x7d   :  { %v25_v12 = vpop.permute.xlu0 %24 }
  0x7e   :  { %v28_v14 = vmul.f32 %v27_v9, %v25_v12 }
  0x80   :  { %v29_v16 = vadd.f32 %v28_v14, %v22_v13 }
  0x82   :  { %v36_v17 = vadd.f32 %v35_v15, %v29_v16 }
  0x84   :  { %64 = vtanh.f32 %v36_v17 }
  0x8a   :  { %v65_v18 = vpop.eup %64 }
  0x8b   :  { %39 = vst.msk [vmem:[#allocation2] sm:$0xff] %vm38_vm0, %v65_v18 }
  0x8c   :  { %50 = dma.vmem_to_hbm [thread:$0]  %s46_s13, 128, %s48_s0, [#allocation3]  }
  0x8d   :  { %90 = dma.done.wait [#allocation3], 128  }
  0x8e   :  { %91 = vsyncadd [#allocation3], 4294967168 }
  0x8f   :  { %55 = vsyncpa [#allocation3], 1 }

</bundles_post_ra>
